<compile_context>
chip_gen: v5e
topology: v5e:2x2
jax: 0.10.0
libtpu: 0.0.40
codegen_flags: <defaults>
</compile_context>

<pallas_src>
import math
import functools
import numpy as np
import jax
import jax.numpy as jnp
from jax.experimental import pallas as pl
from jax.experimental.pallas import tpu as pltpu


# ----------------------------------------------------------------------------
# Beta schedule (matches make_beta_schedule('linear') + set_new_noise_schedule)
# ----------------------------------------------------------------------------
def make_linear_schedule(n_timestep, linear_start=1e-4, linear_end=2e-2):
    betas = np.linspace(linear_start, linear_end, n_timestep, dtype=np.float64)
    alphas = 1.0 - betas
    alphas_cumprod = np.cumprod(alphas, axis=0)
    sqrt_alphas_cumprod_prev = np.sqrt(np.append(1.0, alphas_cumprod))
    return {
        "sqrt_alphas_cumprod_prev": sqrt_alphas_cumprod_prev,
        "num_timesteps": int(n_timestep),
    }


def _pick_lane_tile(L, cap=65536):
    """Largest lane-tile (multiple of 128) dividing L, capped; else whole extent."""
    if L <= cap:
        return L
    t = (min(L, cap) // 128) * 128
    while t > 0 and L % t != 0:
        t -= 128
    return t if t > 0 else L


# ----------------------------------------------------------------------------
# Fused kernel: q_sample + synthetic denoiser + uncertainty loss
#   grid = (B, n_lane_tiles); image blocks are (C, TL); alpha/sigma are SMEM scalars
# ----------------------------------------------------------------------------
def _fused_kernel(inv_elems, n_lane_tiles,
                  alpha_ref, sigma_ref,                 # scalar-prefetch (SMEM, (B,))
                  xgt_ref, xlq_ref, n_ref,              # (C, TL) image tiles
                  wlq_ref, wxn_ref, b_ref, e_ref,       # VMEM-resident denoiser params
                  out_ref, acc_ref):
    b = pl.program_id(0)
    j = pl.program_id(1)

    a = alpha_ref[b]            # per-batch scalar alpha
    sig = sigma_ref[b]          # per-batch scalar sqrt(1 - a^2), precomputed in wrapper

    noise = n_ref[...]                              # (C, TL)
    x_lq = xlq_ref[...]                             # (C, TL)
    x_noisy = a * xgt_ref[...] + sig * noise        # q_sample

    # denoiser: tanh(W @ cat([LQ, x_noisy]) + bias + a*emb), with W split by
    # columns so the channel concat is never materialized.
    # y rows [:C] = noise_pred, rows [C:] = Pt.
    y = jnp.tanh(
        jnp.dot(wlq_ref[...], x_lq, preferred_element_type=jnp.float32)
        + jnp.dot(wxn_ref[...], x_noisy, preferred_element_type=jnp.float32)
        + b_ref[...] + e_ref[...] * a)              # (2C, TL)
    C = noise.shape[0]
    pred = y[:C]
    pt = y[C:]

    # |pred*w - noise*w| == |pred - noise| * w  (w = exp(-Pt) > 0);
    # 2*mean(Pt) is linear, so it folds into the same per-element term.
    term = jnp.abs(pred - noise) * jnp.exp(-pt) + (2.0 * inv_elems) * pt

    if n_lane_tiles == 1:
        # single lane tile per batch: reduce + store directly (no accumulator)
        out_ref[...] = jnp.sum(term).reshape(1, 1)
    else:
        @pl.when(j == 0)
        def _():
            acc_ref[...] = jnp.zeros_like(acc_ref)

        # keep the per-tile reduction vectorized (sublane fold only); defer the
        # cross-lane reduce and the (1,1) store to the last lane tile.
        acc_ref[...] += jnp.sum(term, axis=0, keepdims=True)      # (1, TL)

        @pl.when(j == n_lane_tiles - 1)
        def _():
            out_ref[...] = jnp.sum(acc_ref[...]).reshape(1, 1)


def fused_diffusion_loss(x_gt, x_lq, noise, cont_sqrt_alpha, W, bias, emb,
                         *, lane_tile_cap=65536):
    """x_gt, x_lq, noise: (B, C, HW) f32; cont_sqrt_alpha: (B,) f32;
       W: (2C, 2C); bias, emb: (2C, 1)."""
    B, C, HW = x_gt.shape
    TL = _pick_lane_tile(HW, lane_tile_cap)
    nL = HW // TL
    inv_elems = 1.0 / float(B * C * HW)             # mean(Pt) denominator

    # per-batch sigma computed once in the wrapper (B scalars, not per-lane)
    sigma = jnp.sqrt(jnp.maximum(1.0 - cont_sqrt_alpha * cont_sqrt_alpha, 0.0))

    # column-split 1x1-conv weight -> the LQ/x_noisy concat is never materialized
    w_lq = W[:, :C]                                  # (2C, C)
    w_xn = W[:, C:]                                  # (2C, C)

    # NOTE: (C, TL) blocks are legal because C equals the full channel extent.
    img_spec = pl.BlockSpec((None, C, TL), lambda b, j, *_: (b, 0, j))

    partials = pl.pallas_call(
        functools.partial(_fused_kernel, inv_elems, nL),
        out_shape=jax.ShapeDtypeStruct((B, 1, 1), jnp.float32),
        grid_spec=pltpu.PrefetchScalarGridSpec(
            num_scalar_prefetch=2,                   # alpha, sigma -> SMEM
            grid=(B, nL),
            in_specs=[
                img_spec,                            # x_gt
                img_spec,                            # x_lq
                img_spec,                            # noise
                pl.BlockSpec(memory_space=pltpu.VMEM),   # W[:, :C]
                pl.BlockSpec(memory_space=pltpu.VMEM),   # W[:, C:]
                pl.BlockSpec(memory_space=pltpu.VMEM),   # bias
                pl.BlockSpec(memory_space=pltpu.VMEM),   # emb
            ],
            out_specs=pl.BlockSpec((None, 1, 1), lambda b, j, *_: (b, 0, 0)),
            scratch_shapes=[pltpu.VMEM((1, TL), jnp.float32)],   # vector accumulator
        ),
        compiler_params=pltpu.CompilerParams(
            dimension_semantics=("parallel", "arbitrary")),      # batch || ; lanes = reduce
    )(cont_sqrt_alpha, sigma, x_gt, x_lq, noise, w_lq, w_xn, bias, emb)

    return jnp.sum(partials)                         # sum per-batch partial losses


# ----------------------------------------------------------------------------
# GaussianDiffusion forward (uncertainty_train) glue — fully jittable
# ----------------------------------------------------------------------------
class GaussianDiffusionPallas:
    def __init__(self, channels=4, image_size=16, n_timestep=100,
                 loss_type="l1", conditional=True, key=jax.random.PRNGKey(42)):
        assert loss_type == "l1" and conditional
        self.channels = channels
        self.image_size = image_size
        sched = make_linear_schedule(n_timestep)
        self.num_timesteps = sched["num_timesteps"]
        self.sqrt_alphas_cumprod_prev = jnp.asarray(
            sched["sqrt_alphas_cumprod_prev"], dtype=jnp.float32)          # (T+1,)
        # TODO(synk): the real denoise_fn is an external U-Net module; modeled here
        # as a per-pixel 1x1-conv over cat([LQ, x_noisy]) + noise-level embedding + tanh.
        C2 = 2 * channels
        k1, k2, k3 = jax.random.split(key, 3)
        self.W = jax.random.normal(k1, (C2, C2), jnp.float32) / math.sqrt(C2)
        self.bias = jax.random.normal(k2, (C2, 1), jnp.float32) * 0.1
        self.emb = jax.random.normal(k3, (C2, 1), jnp.float32) * 0.1

    def forward(self, x_in, key, lane_tile_cap=65536):
        x_gt, x_lq = x_in["GT"], x_in["LQ"]          # (B, C, H, W) NCHW, like PyTorch
        B, C, H, Wd = x_gt.shape
        HW = H * Wd
        # contiguous reshape NCHW -> (B, C, HW): no relayout, no extra HBM traffic
        x_gt_f = x_gt.reshape(B, C, HW).astype(jnp.float32)
        x_lq_f = x_lq.reshape(B, C, HW).astype(jnp.float32)

        k_t, k_a, k_n = jax.random.split(key, 3)
        # on-device: t ~ randint(1, T+1); a ~ U(sqrt_ac_prev[t-1], sqrt_ac_prev[t])
        t = jax.random.randint(k_t, (), 1, self.num_timesteps + 1)
        lo = self.sqrt_alphas_cumprod_prev[t - 1]
        hi = self.sqrt_alphas_cumprod_prev[t]
        cont_sqrt_alpha = jax.random.uniform(k_a, (B,), jnp.float32, lo, hi)
        noise = jax.random.normal(k_n, (B, C, HW), dtype=jnp.float32)
        # TODO(synk): on v5e/v6e, feed x_gt/x_lq/noise as bfloat16 (upcast in-kernel)
        # to halve HBM traffic; kept f32 here to match the PyTorch reference exactly.

        loss = fused_diffusion_loss(x_gt_f, x_lq_f, noise, cont_sqrt_alpha,
                                    self.W, self.bias, self.emb,
                                    lane_tile_cap=lane_tile_cap)
        aux = dict(noise=noise, cont_sqrt_alpha=cont_sqrt_alpha)
        return loss, aux


# ----------------------------------------------------------------------------
# Pure-JAX reference (for correctness check)
# ----------------------------------------------------------------------------
def reference_forward(model, x_in, aux):
    x_gt = x_in["GT"].reshape(*x_in["GT"].shape[:2], -1).astype(jnp.float32)
    x_lq = x_in["LQ"].reshape(*x_in["LQ"].shape[:2], -1).astype(jnp.float32)
    a = aux["cont_sqrt_alpha"][:, None, None]
    x_noisy = a * x_gt + jnp.sqrt(1.0 - a * a) * aux["noise"]
    x_cat = jnp.concatenate([x_lq, x_noisy], axis=1)
    y = jnp.einsum("oc,bcl->bol", model.W, x_cat) + model.bias[None] \
        + a * model.emb[None]
    y = jnp.tanh(y)
    C = x_gt.shape[1]
    noise_pred, Pt = y[:, :C], y[:, C:]
    w = jnp.exp(-Pt)
    return jnp.sum(jnp.abs(noise_pred * w - aux["noise"] * w)) + 2.0 * jnp.mean(Pt)


if __name__ == "__main__":
    B, C, H, W = 2, 4, 16, 16
    key = jax.random.PRNGKey(0)
    k_gt, k_lq, k_fwd = jax.random.split(key, 3)
    x_in = {
        "GT": jax.random.normal(k_gt, (B, C, H, W), dtype=jnp.float32),
        "LQ": jax.random.normal(k_lq, (B, C, H, W), dtype=jnp.float32),
    }

    model = GaussianDiffusionPallas(channels=C, image_size=H, n_timestep=100)

    # default path: one lane tile per batch (nL == 1)
    fwd = jax.jit(model.forward)
    loss, aux = fwd(x_in, k_fwd)
    loss = jax.block_until_ready(loss)

    ref = jax.block_until_ready(reference_forward(model, x_in, aux))
    assert np.isfinite(float(loss))
    np.testing.assert_allclose(float(loss), float(ref), rtol=5e-4, atol=1e-3)

    # also exercise the multi-lane-tile (nL > 1) vector-accumulator path
    fwd_tiled = jax.jit(functools.partial(model.forward, lane_tile_cap=128))
    loss_tiled, _ = fwd_tiled(x_in, k_fwd)
    loss_tiled = jax.block_until_ready(loss_tiled)
    np.testing.assert_allclose(float(loss_tiled), float(ref), rtol=5e-4, atol=1e-3)

    print("KERNEL_OK")
</pallas_src>

<mosaic_0001>
module attributes {stable_mosaic.version = 11 : i64} {
  func.func @_fused_kernel(%arg0: i32, %arg1: i32, %arg2: memref<2xf32, #tpu.memory_space<smem>>, %arg3: memref<2xf32, #tpu.memory_space<smem>>, %arg4: memref<1x4x256xf32, #tpu.memory_space<vmem>>, %arg5: memref<1x4x256xf32, #tpu.memory_space<vmem>>, %arg6: memref<1x4x256xf32, #tpu.memory_space<vmem>>, %arg7: memref<8x4xf32, #tpu.memory_space<vmem>>, %arg8: memref<8x4xf32, #tpu.memory_space<vmem>>, %arg9: memref<8x1xf32, #tpu.memory_space<vmem>>, %arg10: memref<8x1xf32, #tpu.memory_space<vmem>>, %arg11: memref<1x1x1xf32, #tpu.memory_space<vmem>>, %arg12: memref<1x256xf32, #tpu.memory_space<vmem>>) attributes {dimension_semantics = [#tpu.dimension_semantics<parallel>, #tpu.dimension_semantics<arbitrary>], iteration_bounds = array<i64: 2, 1>, scalar_prefetch = 2 : i64, scratch_operands = 1 : i64, tpu.core_type = #tpu.core_type<tc>, window_params = [{transform_indices = @transform_0, window_bounds = array<i64: 1, 4, 256>}, {transform_indices = @transform_1, window_bounds = array<i64: 1, 4, 256>}, {transform_indices = @transform_2, window_bounds = array<i64: 1, 4, 256>}, {pipeline_mode = #tpu.pipeline_mode<synchronous>, transform_indices = @transform_3, window_bounds = array<i64: 8, 4>}, {pipeline_mode = #tpu.pipeline_mode<synchronous>, transform_indices = @transform_4, window_bounds = array<i64: 8, 4>}, {pipeline_mode = #tpu.pipeline_mode<synchronous>, transform_indices = @transform_5, window_bounds = array<i64: 8, 1>}, {pipeline_mode = #tpu.pipeline_mode<synchronous>, transform_indices = @transform_6, window_bounds = array<i64: 8, 1>}, {transform_indices = @transform_7, window_bounds = array<i64: 1, 1, 1>}]} {
    %0 = arith.index_cast %arg0 : i32 to index
    %1 = memref.load %arg2[%0] : memref<2xf32, #tpu.memory_space<smem>>
    %2 = arith.index_cast %arg0 : i32 to index
    %3 = memref.load %arg3[%2] : memref<2xf32, #tpu.memory_space<smem>>
    %c0 = arith.constant 0 : index
    %c0_0 = arith.constant 0 : index
    %c0_1 = arith.constant 0 : index
    %4 = vector.load %arg6[%c0, %c0_0, %c0_1] : memref<1x4x256xf32, #tpu.memory_space<vmem>>, vector<1x4x256xf32>
    %5 = vector.shape_cast %4 : vector<1x4x256xf32> to vector<4x256xf32>
    %c0_2 = arith.constant 0 : index
    %c0_3 = arith.constant 0 : index
    %c0_4 = arith.constant 0 : index
    %6 = vector.load %arg5[%c0_2, %c0_3, %c0_4] : memref<1x4x256xf32, #tpu.memory_space<vmem>>, vector<1x4x256xf32>
    %7 = vector.shape_cast %6 : vector<1x4x256xf32> to vector<4x256xf32>
    %c0_5 = arith.constant 0 : index
    %c0_6 = arith.constant 0 : index
    %c0_7 = arith.constant 0 : index
    %8 = vector.load %arg4[%c0_5, %c0_6, %c0_7] : memref<1x4x256xf32, #tpu.memory_space<vmem>>, vector<1x4x256xf32>
    %9 = vector.shape_cast %8 : vector<1x4x256xf32> to vector<4x256xf32>
    %10 = vector.broadcast %1 : f32 to vector<4x256xf32>
    %11 = arith.mulf %10, %9 : vector<4x256xf32>
    %12 = vector.broadcast %3 : f32 to vector<4x256xf32>
    %13 = arith.mulf %12, %5 : vector<4x256xf32>
    %14 = arith.addf %11, %13 : vector<4x256xf32>
    %c0_8 = arith.constant 0 : index
    %c0_9 = arith.constant 0 : index
    %15 = vector.load %arg7[%c0_8, %c0_9] : memref<8x4xf32, #tpu.memory_space<vmem>>, vector<8x4xf32>
    %cst = arith.constant dense<0.000000e+00> : vector<8x256xf32>
    %16 = tpu.matmul %15, %7, %cst {dimension_numbers = #tpu.dot_dimension_numbers<[1], [0], [0], [1], [0, 0, 1, 1], [], []>} : vector<8x4xf32>, vector<4x256xf32>, vector<8x256xf32> -> vector<8x256xf32>
    %c0_10 = arith.constant 0 : index
    %c0_11 = arith.constant 0 : index
    %17 = vector.load %arg8[%c0_10, %c0_11] : memref<8x4xf32, #tpu.memory_space<vmem>>, vector<8x4xf32>
    %cst_12 = arith.constant dense<0.000000e+00> : vector<8x256xf32>
    %18 = tpu.matmul %17, %14, %cst_12 {dimension_numbers = #tpu.dot_dimension_numbers<[1], [0], [0], [1], [0, 0, 1, 1], [], []>} : vector<8x4xf32>, vector<4x256xf32>, vector<8x256xf32> -> vector<8x256xf32>
    %19 = arith.addf %16, %18 : vector<8x256xf32>
    %c0_13 = arith.constant 0 : index
    %c0_14 = arith.constant 0 : index
    %20 = vector.load %arg9[%c0_13, %c0_14] : memref<8x1xf32, #tpu.memory_space<vmem>>, vector<8x1xf32>
    %21 = vector.broadcast %20 : vector<8x1xf32> to vector<8x256xf32>
    %22 = arith.addf %19, %21 : vector<8x256xf32>
    %c0_15 = arith.constant 0 : index
    %c0_16 = arith.constant 0 : index
    %23 = vector.load %arg10[%c0_15, %c0_16] : memref<8x1xf32, #tpu.memory_space<vmem>>, vector<8x1xf32>
    %24 = vector.broadcast %1 : f32 to vector<8x1xf32>
    %25 = arith.mulf %23, %24 : vector<8x1xf32>
    %26 = vector.broadcast %25 : vector<8x1xf32> to vector<8x256xf32>
    %27 = arith.addf %22, %26 : vector<8x256xf32>
    %28 = math.tanh %27 : vector<8x256xf32>
    %29 = vector.extract_strided_slice %28 {offsets = [0, 0], sizes = [4, 256], strides = [1, 1]} : vector<8x256xf32> to vector<4x256xf32>
    %30 = vector.extract_strided_slice %28 {offsets = [4, 0], sizes = [4, 256], strides = [1, 1]} : vector<8x256xf32> to vector<4x256xf32>
    %31 = arith.subf %29, %5 : vector<4x256xf32>
    %32 = math.absf %31 : vector<4x256xf32>
    %cst_17 = arith.constant 0.000000e+00 : f32
    %33 = vector.broadcast %cst_17 : f32 to vector<4x256xf32>
    %34 = arith.subf %33, %30 : vector<4x256xf32>
    %35 = math.exp %34 : vector<4x256xf32>
    %36 = arith.mulf %32, %35 : vector<4x256xf32>
    %cst_18 = arith.constant 9.765625E-4 : f32
    %37 = vector.broadcast %cst_18 : f32 to vector<4x256xf32>
    %38 = arith.mulf %37, %30 : vector<4x256xf32>
    %39 = arith.addf %36, %38 : vector<4x256xf32>
    %40 = vector.shape_cast %39 : vector<4x256xf32> to vector<1x4x256xf32>
    %cst_19 = arith.constant dense<0.000000e+00> : vector<1xf32>
    %41 = vector.multi_reduction <add>, %40, %cst_19 [1, 2] : vector<1x4x256xf32> to vector<1xf32>
    %42 = vector.shape_cast %41 : vector<1xf32> to vector<1x1x1xf32>
    %43 = vector.extract %42[0, 0, 0] : f32 from vector<1x1x1xf32>
    %44 = vector.broadcast %43 : f32 to vector<1x1xf32>
    %c0_20 = arith.constant 0 : index
    %c0_21 = arith.constant 0 : index
    %c0_22 = arith.constant 0 : index
    %45 = vector.load %arg11[%c0_20, %c0_21, %c0_22] : memref<1x1x1xf32, #tpu.memory_space<vmem>>, vector<1x1x1xf32>
    %46 = vector.shape_cast %45 : vector<1x1x1xf32> to vector<1x1xf32>
    %47 = vector.shape_cast %44 : vector<1x1xf32> to vector<1x1x1xf32>
    tpu.vector_store %arg11[%c0_20, %c0_21, %c0_22], %47 {strides = array<i32>} : memref<1x1x1xf32, #tpu.memory_space<vmem>>, vector<1x1x1xf32>,
    return
  }
  func.func @transform_0(%arg0: i32, %arg1: i32, %arg2: memref<2xf32, #tpu.memory_space<smem>>, %arg3: memref<2xf32, #tpu.memory_space<smem>>) -> (i32, i32, i32) {
    %c0_i32 = arith.constant 0 : i32
    %c0_i32_0 = arith.constant 0 : i32
    return %arg0, %c0_i32, %arg1 : i32, i32, i32
  }
  func.func @transform_1(%arg0: i32, %arg1: i32, %arg2: memref<2xf32, #tpu.memory_space<smem>>, %arg3: memref<2xf32, #tpu.memory_space<smem>>) -> (i32, i32, i32) {
    %c0_i32 = arith.constant 0 : i32
    %c0_i32_0 = arith.constant 0 : i32
    return %arg0, %c0_i32, %arg1 : i32, i32, i32
  }
  func.func @transform_2(%arg0: i32, %arg1: i32, %arg2: memref<2xf32, #tpu.memory_space<smem>>, %arg3: memref<2xf32, #tpu.memory_space<smem>>) -> (i32, i32, i32) {
    %c0_i32 = arith.constant 0 : i32
    %c0_i32_0 = arith.constant 0 : i32
    return %arg0, %c0_i32, %arg1 : i32, i32, i32
  }
  func.func @transform_3(%arg0: i32, %arg1: i32, %arg2: memref<2xf32, #tpu.memory_space<smem>>, %arg3: memref<2xf32, #tpu.memory_space<smem>>) -> (i32, i32) {
    %c0_i32 = arith.constant 0 : i32
    %c0_i32_0 = arith.constant 0 : i32
    %c0_i32_1 = arith.constant 0 : i32
    return %c0_i32, %c0_i32_0 : i32, i32
  }
  func.func @transform_4(%arg0: i32, %arg1: i32, %arg2: memref<2xf32, #tpu.memory_space<smem>>, %arg3: memref<2xf32, #tpu.memory_space<smem>>) -> (i32, i32) {
    %c0_i32 = arith.constant 0 : i32
    %c0_i32_0 = arith.constant 0 : i32
    %c0_i32_1 = arith.constant 0 : i32
    return %c0_i32, %c0_i32_0 : i32, i32
  }
  func.func @transform_5(%arg0: i32, %arg1: i32, %arg2: memref<2xf32, #tpu.memory_space<smem>>, %arg3: memref<2xf32, #tpu.memory_space<smem>>) -> (i32, i32) {
    %c0_i32 = arith.constant 0 : i32
    %c0_i32_0 = arith.constant 0 : i32
    %c0_i32_1 = arith.constant 0 : i32
    return %c0_i32, %c0_i32_0 : i32, i32
  }
  func.func @transform_6(%arg0: i32, %arg1: i32, %arg2: memref<2xf32, #tpu.memory_space<smem>>, %arg3: memref<2xf32, #tpu.memory_space<smem>>) -> (i32, i32) {
    %c0_i32 = arith.constant 0 : i32
    %c0_i32_0 = arith.constant 0 : i32
    %c0_i32_1 = arith.constant 0 : i32
    return %c0_i32, %c0_i32_0 : i32, i32
  }
  func.func @transform_7(%arg0: i32, %arg1: i32, %arg2: memref<2xf32, #tpu.memory_space<smem>>, %arg3: memref<2xf32, #tpu.memory_space<smem>>) -> (i32, i32, i32) {
    %c0_i32 = arith.constant 0 : i32
    %c0_i32_0 = arith.constant 0 : i32
    %c0_i32_1 = arith.constant 0 : i32
    return %arg0, %c0_i32, %c0_i32_0 : i32, i32, i32
  }
}

</mosaic_0001>

<bundles_post_ra>
// kernel: forward.1
= control target key start
LH: loop header
LB: loop body
LE: loop exit
PB: predicated region body
PF: predicated region fallthrough
CT: control target
= control target key end

     0   :  { %s783_s15 = smov [#allocation4]   ;;  %s784_s16 = smov [#allocation5]   ;;  %s903_s0 = inlined_call_operand.vmem [shape: f32[2], index: 0, kind: input, shape index: {}]   ;;  %s904_s2 = inlined_call_operand.vmem [shape: f32[2,4,256], index: 2, kind: input, shape index: {}]   ;;  %s905_s3 = inlined_call_operand.vmem [shape: f32[2,4,256], index: 3, kind: input, shape index: {}]   ;;  %s906_s4 = inlined_call_operand.vmem [shape: f32[2,4,256], index: 4, kind: input, shape index: {}]   ;;  %s907_s5 = inlined_call_operand.vmem [shape: f32[8,4], index: 5, kind: input, shape index: {}]   ;;  %s908_s6 = inlined_call_operand.vmem [shape: f32[8,4], index: 6, kind: input, shape index: {}]   ;;  %s909_s7 = inlined_call_operand.vmem [shape: f32[8,1], index: 7, kind: input, shape index: {}]   ;;  %s910_s8 = inlined_call_operand.vmem [shape: f32[8,1], index: 8, kind: input, shape index: {}]   ;;  %s911_s9 = inlined_call_operand.vmem [shape: f32[2,1,1], index: 9, kind: output, shape index: {}]   ;;  %s912_s1 = inlined_call_operand.vmem [shape: f32[2], index: 1, kind: input, shape index: {}]  }
   0x1   :  { %s15_s11 = sshll.u32 %s903_s0, 4  ;;  %s20_s14 = sshll.u32 %s912_s1, 4  ;;  %s16_s11 = int_to_ptr.vmem [resolvable:$true] %s15_s11  ;;  %s21_s14 = int_to_ptr.vmem [resolvable:$true] %s20_s14 }
   0x2   :  { %18 = dma.vmem_to_smem %s16_s11, 16, %s783_s15, [#allocation3] }
   0x3   :  { %23 = dma.vmem_to_smem %s21_s14, 16, %s784_s16, [#allocation3] }
   0x4   :  { %769 = dma.done.wait [#allocation3], 32 }
   0x5   :  { %770 = vsyncadd [#allocation3], 4294967264 }
   0x6   :  { %26 = sfence }
   0x7   :  { %s842_s17 = smov 0   ;;  %s844_s18 = smov 0  }
   0x8   :  { %s846_s19 = smov 0  }
   0x9 LB: > { %s44_s0 = sadd.s32 1, %s777_s18  ;;  %p675_p0 = scmp.ge.s32.totalorder %s781_s19, 1  ;;  %s781_s19 = sphi %s846_s19, %s32_s19   ;;  %s777_s18 = sphi %s844_s18, %s914_s18   ;;  %s773_s17 = sphi %s842_s17, %s913_s17  }
   0xa   : > { %p46_p1 = scmp.ge.s32.totalorder %s44_s0, 2  ;;  %p305_p2 = scmp.lt.s32.totalorder %s781_s19, 3 }
   0xc   : > { %s916_s0 = smov (%p46_p1, %s44_s0), 0  ;;  %p306_p3 = pnand %p675_p0, %p305_p2 }
   0xd   : > { %p358_p4 = scmp.lt.s32.totalorder (!%p306_p3), %s773_s17, 1  ;;  %s390_s1 = sld [smem:[#allocation4 + %s773_s17]] (!%p306_p3) }
   0xe   : > { %309 = sbr.rel (%p306_p3) target bundleno = 391 (0x187), region = 48  ;;  %s391_s20 = sld [smem:[#allocation5 + %s773_s17]] (!%p306_p3) }
  0x13   : > { %v785_v0 = vmov 0   ;;  %v506_v1 = vld [vmem:[%s909_s7] sm:$0xff]  ;;  %s918_s17 = smov (!%p358_p4, %s773_s17), 1  ;;  %v395_v4 = vstv %s390_s1  ;;  %vm410_vm0 = vcmask 1043456   ;;  %vm406_vm1 = vcmask 31744  }
  0x14   : > { %724 = vset.pattern.permute.xlu0 %v785_v0  ;;  %s692_s23 = sshll.u32 %s918_s17, 3  ;;  %v514_v2 = vld [vmem:[%s910_s8] sm:$0xff]  ;;  %v397_v7 = vstv %s391_s20  ;;  %s389_s22 = scalar_lea.vmem %s911_s9, %s918_s17  ;;  %vm572_vm2 = vcmask 0  }
  0x15   : > { %509 = vperm.xlu0 %724, %v506_v1   ;;  %s365_s28 = scalar_lea.vmem %s904_s2, %s692_s23  ;;  %s385_s10 = scalar_lea.vmem %s906_s4, %s692_s23  ;;  %v515_v8 = vmul.f32 %v514_v2, %v395_v4  ;;  %v401_v12 = vld [vmem:[%s908_s6] sm:$0xff] }
  0x16   : > { %v394_v3 = vld [vmem:[%s365_s28] sm:$0xff]  ;;  %s375_s13 = scalar_lea.vmem %s905_s3, %s692_s23 }
  0x17   : > { %v392_v5 = vld [vmem:[%s385_s10] sm:$0xff]  ;;  %v396_v6 = vmul.f32 %v395_v4, %v394_v3 }
  0x18   : > { %v398_v9 = vmul.f32 %v397_v7, %v392_v5  ;;  %v393_v11 = vld [vmem:[%s375_s13] sm:$0xff] }
  0x19   : > { %v400_v15 = vld [vmem:[%s907_s5] sm:$0xff] }
  0x1a   : > { %v399_v10 = vadd.f32 %v398_v9, %v396_v6 }
  0x1c   : > { %403 = vst [vmem:[#allocation1] ss:$2 sm:$0xff] %v399_v10 }
  0x1d   : > { %518 = vperm.xlu0 %724, %v515_v8  }
  0x23   : > { %v404_v13 = vld.sshfl [vmem:[#allocation1] sm:$0xff pattern:$0x75316420]  ;;  %v405_v14 = vld.sshfl [vmem:[#allocation1 + $0x8] sm:$0xff pattern:$0x75316420] }
  0x24   : > { %456 = vst [vmem:[#allocation1] ss:$2 sm:$0xff] %v393_v11  ;;  %682 = vmatpush.msk.msra.mxu0 %vm410_vm0, %v404_v13  ;;  %684 = vmatpush.msk.msra.mxu1 %vm410_vm0, %v405_v14 }
  0x25   : > { %683 = vmatmul.msk.f32.vlgmr.msra.gmra.mxu0 %vm406_vm1, %v401_v12  ;;  %685 = vmatmul.msk.f32.vlgmr.msra.gmra.mxu1 %vm406_vm1, %v401_v12 }
  0x2b   : > { %v457_v16 = vld.sshfl [vmem:[#allocation1] sm:$0xff pattern:$0x75316420]  ;;  %v458_v17 = vld.sshfl [vmem:[#allocation1 + $0x8] sm:$0xff pattern:$0x75316420] }
  0x2c   : > { %686 = vmatpush.msk.msra.mxu2 %vm410_vm0, %v457_v16  ;;  %688 = vmatpush.msk.msra.mxu3 %vm410_vm0, %v458_v17  ;;  %526 = vst [vmem:[#allocation1] ss:$2 sm:$0xff] %v392_v5 }
  0x2d   : > { %687 = vmatmul.msk.f32.vlgmr.msra.gmra.mxu2 %vm406_vm1, %v400_v15  ;;  %689 = vmatmul.msk.f32.vlgmr.msra.gmra.mxu3 %vm406_vm1, %v400_v15 }
  0x33   : > { %v527_v36 = vld.sshfl [vmem:[#allocation1] sm:$0xff pattern:$0x75316420]  ;;  %v528_v37 = vld.sshfl [vmem:[#allocation1 + $0x8] sm:$0xff pattern:$0x75316420] }
  0x87   : > { %v510_v18 = vpop.permute.xlu0 %509 }
  0x8f   : > { %v519_v27 = vpop.permute.xlu0 %518 }
  0xa2   : > { %v432_v19 = vpop.f32.mrf.mxu0  ;;  %v452_v20 = vpop.f32.mrf.mxu1 }
  0xb0   : > { %v483_v21 = vpop.f32.mrf.mxu2  ;;  %v503_v22 = vpop.f32.mrf.mxu3 }
  0xb1   : > { %v484_v23 = vadd.f32 %v483_v21, %v432_v19  ;;  %v504_v24 = vadd.f32 %v503_v22, %v452_v20 }
  0xb3   : > { %v512_v25 = vadd.f32 %v510_v18, %v484_v23  ;;  %v513_v26 = vadd.f32 %v510_v18, %v504_v24 }
  0xb5   : > { %v521_v28 = vadd.f32 %v519_v27, %v512_v25  ;;  %v522_v29 = vadd.f32 %v519_v27, %v513_v26 }
  0xb7   : > { %725 = vtanh.f32 %v521_v28 }
  0xb8   : > { %727 = vtanh.f32 %v522_v29 }
  0xbd   : > { %v726_v30 = vpop.eup %725 }
  0xbe   : > { %v728_v31 = vpop.eup %727  ;;  %v535_v32 = vsub.f32 0.0, %v726_v30  ;;  %v531_v38 = vsub.f32 %v726_v30, %v527_v36  ;;  %v549_v40 = vmul.f32 0.0009765625, %v726_v30 }
  0xbf   : > { %v536_v33 = vsub.f32 0.0, %v728_v31  ;;  %v532_v39 = vsub.f32 %v728_v31, %v528_v37  ;;  %v550_v42 = vmul.f32 0.0009765625, %v728_v31 }
  0xc0   : > { %v537_v34 = vmul.f32 1.442695, %v535_v32  ;;  %v533_v44 = vand.u32 2147483647, %v531_v38  ;;  %v553_v49 = vrot.slane %v549_v40, 4 }
  0xc1   : > { %v539_v35 = vmul.f32 1.442695, %v536_v33  ;;  %v534_v46 = vand.u32 2147483647, %v532_v39  ;;  %v554_v51 = vrot.slane %v550_v42, 4 }
  0xc2   : > { %729 = vpow2.f32 %v537_v34 }
  0xc3   : > { %731 = vpow2.f32 %v539_v35 }
  0xc8   : > { %v730_v41 = vpop.eup %729 }
  0xc9   : > { %v732_v43 = vpop.eup %731  ;;  %v543_v45 = vrot.slane %v730_v41, 4 }
  0xca   : > { %v544_v47 = vrot.slane %v732_v43, 4 }
  0xcb   : > { %v547_v48 = vmul.f32 %v543_v45, %v533_v44 }
  0xcc   : > { %v548_v50 = vmul.f32 %v544_v47, %v534_v46 }
  0xcd   : > { %v557_v52 = vadd.f32 %v553_v49, %v547_v48 }
  0xce   : > { %v558_v53 = vadd.f32 %v554_v51, %v548_v50 }
  0xcf   : > { %v559_v54 = vsel %vm410_vm0, %v557_v52, 0.0 }
  0xd0   : > { %v560_v55 = vsel %vm410_vm0, %v558_v53, 0.0 }
  0xd1   : > { %v561_v56 = vadd.f32 %v560_v55, %v559_v54 }
  0xd3   : > { %562 = vadd.xlane.f32.xlu1 %v561_v56 }
 0x146   : > { %v563_v57 = vpop.xlane.xlu1 %562 }
 0x147   : > { %v564_v58 = vrot.slane %v563_v57, 4 }
 0x149   : > { %v565_v59 = vadd.f32 %v564_v58, %v563_v57 }
 0x14b   : > { %v566_v60 = vrot.slane %v565_v59, 2 }
 0x14d   : > { %v567_v61 = vadd.f32 %v566_v60, %v565_v59 }
 0x14f   : > { %v568_v62 = vrot.slane %v567_v61, 1 }
 0x151   : > { %v569_v63 = vadd.f32 %v568_v62, %v567_v61 }
 0x153   : > { %695 = vpush %v569_v63 }
 0x184   : > { %s696_s23 = spop %695 }
 0x185   : > { %v571_v0 = vstv %s696_s23 }
 0x186   : > { %573 = vst.msk [vmem:[%s389_s22] sm:$0x1] %vm572_vm2, %v571_v0 }
 0x187 PF: > { %s32_s19 = sadd.s32 1, %s781_s19   ;;  %s913_s17 = smov %s777_s18 }
 0x188   : > { %p29_p5 = scmp.ge.s32.totalorder %s32_s19, 4   ;;  %s914_s18 = smov %s916_s0 }
 0x18a   :  { %31 = sbr.rel (!%p29_p5) target bundleno = 9 (0x9), region = 84 }

</bundles_post_ra>
